<compile_context>
chip_gen: v6e
topology: v6e:2x2x1
jax: 0.10.0
libtpu: 0.0.40
codegen_flags: <defaults>
</compile_context>

<pallas_src>
import jax
import jax.numpy as jnp
from jax import lax
from jax.experimental import pallas as pl
from jax.experimental.pallas import tpu as pltpu


_LANE = 128
_MIB = 1024 * 1024
_KERNEL_CODES = ("positive", "square", "exp", "sqrt", "log")


def _round_up(a, b):
    return ((a + b - 1) // b) * b


def _round_down(a, b):
    return (a // b) * b


# ----------------------------------------------------------------------------
# Elementwise transform math (runs inside the kernel, float32 inputs)
# ----------------------------------------------------------------------------
def _apply_elementwise(code, x):
    if code == "positive":          # torch.nn.functional.softplus
        return jax.nn.softplus(x)
    if code == "square":
        return x * x
    if code == "exp":
        return jnp.exp(x)
    if code == "sqrt":
        return jnp.sqrt(x)
    if code == "log":
        return jnp.log(x + 1e-6)
    return x


def _make_kernel(groups, param_count, lane_mod):
    """Kernel applying per-column transforms on a (rows, cols) tile.

    groups: tuple of (code, runs) with runs = ((lo, hi), ...) in column space.
    lane_mod: dense path -> a lane's column index is lane & (param_count - 1)
              (param_count is a power of two there); otherwise column == lane.
    """

    def kernel(x_ref, o_ref):
        x = x_ref[...]
        xf = x.astype(jnp.float32)          # f32 transcendentals (v5e-safe)
        col = lax.broadcasted_iota(jnp.int32, x.shape, 1)
        if lane_mod:
            col = col & (param_count - 1)
        y = xf
        for code, runs in groups:
            t = _apply_elementwise(code, xf)
            if len(runs) == 1 and runs[0] == (0, param_count):
                y = t                        # covers every column: no mask needed
            else:
                m = None
                for lo, hi in runs:
                    r = (col >= lo) & (col < hi)
                    m = r if m is None else (m | r)
                y = jnp.where(m, t, y)
        o_ref[...] = y.astype(o_ref.dtype)

    return kernel


# ----------------------------------------------------------------------------
# Generation-aware tiling
# ----------------------------------------------------------------------------
def _vmem_budget():
    try:
        cap = int(pltpu.get_tpu_info().vmem_capacity_bytes)
    except Exception:
        cap = 64 * _MIB                      # conservative fallback
    if cap <= 64 * _MIB:
        # v7x-class: 64 MiB physical VMEM; keep blocks modest so the
        # double-buffered in+out pipeline stays far below the scoped limit.
        return 2 * _MIB, 32 * _MIB
    # v5e / v6e (128 MiB VMEM): bigger blocks amortize per-grid-step overhead.
    return 4 * _MIB, 64 * _MIB


def _pick_tile_rows(n_rows, n_cols, itemsize, block_bytes):
    # Actual VMEM footprint includes lane padding to 128 (and sublane packing),
    # not just n_cols * itemsize.
    padded_cols = _round_up(n_cols, _LANE)
    granule = 8 * max(1, 4 // itemsize)      # f32 -> 8, bf16 -> 16, int8 -> 32
    tile = max(granule,
               _round_down(block_bytes // (padded_cols * itemsize), granule))
    if n_rows > 2 * granule:
        # Prefer >= 2 grid steps so the pipeline double-buffers and
        # dimension_semantics=("parallel",) can split across TensorCores.
        tile = min(tile, _round_up(pl.cdiv(n_rows, 2), granule))
    if tile >= n_rows:
        return n_rows                        # single full-extent block
    return tile


def _run_elementwise_kernel(x2d, groups, param_count, lane_mod):
    n_rows, n_cols = x2d.shape
    itemsize = jnp.dtype(x2d.dtype).itemsize
    block_bytes, vmem_limit = _vmem_budget()
    tr = _pick_tile_rows(n_rows, n_cols, itemsize, block_bytes)
    kernel = _make_kernel(groups, param_count, lane_mod)
    return pl.pallas_call(
        kernel,
        out_shape=jax.ShapeDtypeStruct((n_rows, n_cols), x2d.dtype),
        grid=(pl.cdiv(n_rows, tr),),
        in_specs=[pl.BlockSpec((tr, n_cols), lambda i: (i, 0))],
        out_specs=pl.BlockSpec((tr, n_cols), lambda i: (i, 0)),
        compiler_params=pltpu.CompilerParams(
            dimension_semantics=("parallel",),
            vmem_limit_bytes=vmem_limit,
        ),
    )(x2d)


# ----------------------------------------------------------------------------
# JAX port of BaseDistribution with the per-column transforms in Pallas.
# ----------------------------------------------------------------------------
class BaseDistribution:
    def __init__(self, name, param_names):
        self._name = name
        self.param_names = list(param_names)
        self.param_count = len(param_names)

    @property
    def name(self):
        return self._name

    @property
    def parameter_count(self):
        return self.param_count

    def _transform_specs(self):
        return [getattr(self, f"{p}_transform", "none") for p in self.param_names]

    def forward(self, predictions):
        B, P = predictions.shape
        assert P == self.param_count
        specs = self._transform_specs()

        kernel_codes = []
        prob_cols = []
        callable_cols = []
        for i, spec in enumerate(specs):
            if callable(spec):
                # TODO(synk): arbitrary Python callables can't be baked into a
                # static Pallas kernel; applied per-column with XLA below.
                callable_cols.append((i, spec))
                kernel_codes.append("none")
            elif spec == "probabilities":
                # softmax over the *batch* axis needs a cross-block reduction;
                # handled with XLA below so the main kernel stays batch-tiled.
                # TODO(synk): could be fused as a two-pass Pallas softmax.
                prob_cols.append(i)
                kernel_codes.append("none")
            elif spec in _KERNEL_CODES:
                kernel_codes.append(spec)
            else:
                kernel_codes.append("none")   # PyTorch fallback: identity

        # Fuse contiguous runs of identical codes and group per code so every
        # transform is evaluated once per tile.
        groups_dict = {}
        run_code, run_lo = None, 0
        for i, c in enumerate(kernel_codes + ["__end__"]):
            if c != run_code:
                if run_code is not None and run_code != "none":
                    groups_dict.setdefault(run_code, []).append((run_lo, i))
                run_code, run_lo = c, i
        groups = tuple((c, tuple(rs)) for c, rs in groups_dict.items())

        if not groups:
            # Everything the kernel would do is identity -> skip the pallas_call.
            base = predictions
        elif P <= _LANE and _LANE % P == 0 and (B * P) % _LANE == 0:
            # Lane-dense path: view the contiguous (B, P) buffer as (B*P/128, 128).
            x2d = predictions.reshape((B * P) // _LANE, _LANE)
            out2d = _run_elementwise_kernel(x2d, groups, P, lane_mod=True)
            base = out2d.reshape(B, P)
        else:
            # Native (B, P) layout; P (< 128 typically) is the full last dim.
            base = _run_elementwise_kernel(predictions, groups, P, lane_mod=False)

        out = base
        for i in prob_cols:
            col = jax.nn.softmax(predictions[:, i].astype(jnp.float32), axis=-1)
            out = out.at[:, i].set(col.astype(out.dtype))
        for i, fn in callable_cols:
            out = out.at[:, i].set(jnp.asarray(fn(predictions[:, i])).astype(out.dtype))
        return out

    __call__ = forward


# Pure-JAX reference (mirrors the PyTorch loop) for correctness checks.
def _reference_forward(dist_obj, predictions):
    specs = dist_obj._transform_specs()
    cols = []
    for idx, spec in enumerate(specs):
        c = predictions[:, idx]
        if callable(spec):
            c = spec(c)
        elif spec == "positive":
            c = jax.nn.softplus(c)
        elif spec == "square":
            c = c * c
        elif spec == "exp":
            c = jnp.exp(c)
        elif spec == "sqrt":
            c = jnp.sqrt(c)
        elif spec == "log":
            c = jnp.log(c + 1e-6)
        elif spec == "probabilities":
            c = jax.nn.softmax(c, axis=-1)
        cols.append(c[:, None])
    return jnp.concatenate(cols, axis=1)


if __name__ == "__main__":
    key = jax.random.PRNGKey(0)
    k1, k2, k3, k4 = jax.random.split(key, 4)

    # Test 1: mixed elementwise transforms, tiny batch (native path, single block).
    d1 = BaseDistribution("demo", ["loc", "scale", "shape", "rate"])
    d1.loc_transform = "none"
    d1.scale_transform = "positive"
    d1.shape_transform = "square"
    d1.rate_transform = "exp"
    x1 = jax.random.normal(k1, (8, 4), dtype=jnp.float32)
    out1 = jax.block_until_ready(d1(x1))
    ref1 = _reference_forward(d1, x1)
    assert out1.shape == (8, 4)
    assert jnp.allclose(out1, ref1, atol=1e-5, rtol=1e-5)

    # Test 2: probabilities (softmax over batch, handled outside the tiled kernel),
    # log and sqrt on strictly positive inputs.
    d2 = BaseDistribution("demo2", ["p", "q", "r"])
    d2.p_transform = "probabilities"
    d2.q_transform = "log"
    d2.r_transform = "sqrt"
    x2 = jnp.abs(jax.random.normal(k2, (8, 3), dtype=jnp.float32)) + 0.1
    out2 = jax.block_until_ready(d2(x2))
    ref2 = _reference_forward(d2, x2)
    assert out2.shape == (8, 3)
    assert jnp.allclose(out2, ref2, atol=1e-5, rtol=1e-5)

    # Test 3: lane-dense path (P divides 128, B*P % 128 == 0) with a repeated,
    # non-contiguous transform (multi-run masks).
    d3 = BaseDistribution("demo3", ["a", "b", "c", "d"])
    d3.a_transform = "exp"
    d3.b_transform = "none"
    d3.c_transform = "exp"
    d3.d_transform = "sqrt"
    x3 = jnp.abs(jax.random.normal(k3, (256, 4), dtype=jnp.float32)) + 0.1
    out3 = jax.block_until_ready(d3(x3))
    ref3 = _reference_forward(d3, x3)
    assert out3.shape == (256, 4)
    assert jnp.allclose(out3, ref3, atol=1e-5, rtol=1e-5)

    # Test 4: native path with a multi-step grid and a ragged final block
    # (no padding/slicing in the wrapper; Pallas clips the boundary block).
    d4 = BaseDistribution("demo4", ["u", "v", "w"])
    d4.u_transform = "positive"
    d4.v_transform = "none"
    d4.w_transform = "square"
    x4 = jax.random.normal(k4, (1300, 3), dtype=jnp.float32)
    out4 = jax.block_until_ready(d4(x4))
    ref4 = _reference_forward(d4, x4)
    assert out4.shape == (1300, 3)
    assert jnp.allclose(out4, ref4, atol=1e-5, rtol=1e-5)

    print("KERNEL_OK")
</pallas_src>

<mosaic_0001>
module attributes {stable_mosaic.version = 11 : i64} {
  func.func @kernel(%arg0: i32, %arg1: memref<8x4xf32, #tpu.memory_space<vmem>>, %arg2: memref<8x4xf32, #tpu.memory_space<vmem>>) attributes {dimension_semantics = [#tpu.dimension_semantics<parallel>], iteration_bounds = array<i64: 1>, scalar_prefetch = 0 : i64, scratch_operands = 0 : i64, tpu.core_type = #tpu.core_type<tc>, window_params = [{transform_indices = @transform_0, window_bounds = array<i64: 8, 4>}, {transform_indices = @transform_1, window_bounds = array<i64: 8, 4>}]} {
    %c0 = arith.constant 0 : index
    %c0_0 = arith.constant 0 : index
    %0 = vector.load %arg1[%c0, %c0_0] : memref<8x4xf32, #tpu.memory_space<vmem>>, vector<8x4xf32>
    %1 = tpu.iota {dimensions = array<i32: 1>} : vector<8x4xi32>
    %cst = arith.constant 0.000000e+00 : f32
    %2 = vector.broadcast %cst : f32 to vector<8x4xf32>
    %3 = arith.maximumf %0, %2 : vector<8x4xf32>
    %4 = vector.broadcast %cst : f32 to vector<8x4xf32>
    %5 = arith.subf %0, %4 : vector<8x4xf32>
    %6 = arith.cmpf one, %5, %5 : vector<8x4xf32>
    %7 = vector.broadcast %cst : f32 to vector<8x4xf32>
    %8 = arith.addf %0, %7 : vector<8x4xf32>
    %9 = math.absf %5 : vector<8x4xf32>
    %cst_1 = arith.constant 0.000000e+00 : f32
    %10 = vector.broadcast %cst_1 : f32 to vector<8x4xf32>
    %11 = arith.subf %10, %9 : vector<8x4xf32>
    %12 = math.exp %11 : vector<8x4xf32>
    %13 = math.log1p %12 : vector<8x4xf32>
    %14 = arith.addf %3, %13 : vector<8x4xf32>
    %15 = arith.select %6, %8, %14 : vector<8x4xi1>, vector<8x4xf32>
    %c1_i32 = arith.constant 1 : i32
    %16 = vector.broadcast %c1_i32 : i32 to vector<8x4xi32>
    %17 = arith.cmpi sge, %1, %16 : vector<8x4xi32>
    %c2_i32 = arith.constant 2 : i32
    %18 = vector.broadcast %c2_i32 : i32 to vector<8x4xi32>
    %19 = arith.cmpi slt, %1, %18 : vector<8x4xi32>
    %20 = arith.andi %17, %19 : vector<8x4xi1>
    %21 = arith.select %20, %15, %0 : vector<8x4xi1>, vector<8x4xf32>
    %22 = arith.mulf %0, %0 : vector<8x4xf32>
    %c2_i32_2 = arith.constant 2 : i32
    %23 = vector.broadcast %c2_i32_2 : i32 to vector<8x4xi32>
    %24 = arith.cmpi sge, %1, %23 : vector<8x4xi32>
    %c3_i32 = arith.constant 3 : i32
    %25 = vector.broadcast %c3_i32 : i32 to vector<8x4xi32>
    %26 = arith.cmpi slt, %1, %25 : vector<8x4xi32>
    %27 = arith.andi %24, %26 : vector<8x4xi1>
    %28 = arith.select %27, %22, %21 : vector<8x4xi1>, vector<8x4xf32>
    %29 = math.exp %0 : vector<8x4xf32>
    %c3_i32_3 = arith.constant 3 : i32
    %30 = vector.broadcast %c3_i32_3 : i32 to vector<8x4xi32>
    %31 = arith.cmpi sge, %1, %30 : vector<8x4xi32>
    %c4_i32 = arith.constant 4 : i32
    %32 = vector.broadcast %c4_i32 : i32 to vector<8x4xi32>
    %33 = arith.cmpi slt, %1, %32 : vector<8x4xi32>
    %34 = arith.andi %31, %33 : vector<8x4xi1>
    %35 = arith.select %34, %29, %28 : vector<8x4xi1>, vector<8x4xf32>
    %c0_4 = arith.constant 0 : index
    %c0_5 = arith.constant 0 : index
    %36 = vector.load %arg2[%c0_4, %c0_5] : memref<8x4xf32, #tpu.memory_space<vmem>>, vector<8x4xf32>
    tpu.vector_store %arg2[%c0_4, %c0_5], %35 {strides = array<i32>} : memref<8x4xf32, #tpu.memory_space<vmem>>, vector<8x4xf32>,
    return
  }
  func.func @transform_0(%arg0: i32) -> (i32, i32) {
    %c0_i32 = arith.constant 0 : i32
    %c0_i32_0 = arith.constant 0 : i32
    return %arg0, %c0_i32 : i32, i32
  }
  func.func @transform_1(%arg0: i32) -> (i32, i32) {
    %c0_i32 = arith.constant 0 : i32
    %c0_i32_0 = arith.constant 0 : i32
    return %arg0, %c0_i32 : i32, i32
  }
}

</mosaic_0001>

<bundles_post_ra>
// kernel: tpu_custom_call.1
= control target key start
LH: loop header
LB: loop body
LE: loop exit
PB: predicated region body
PF: predicated region fallthrough
CT: control target
= control target key end

     0   :  { %v9_v8 = vlaneseq  ;;  %vm44_vm11 = vcmask 31744   ;;  %s72_s0 = inlined_call_operand.vmem [shape: f32[8,4], index: 0, kind: input, shape index: {}]   ;;  %s73_s1 = inlined_call_operand.vmem [shape: f32[8,4], index: 1, kind: output, shape index: {}]  }
   0x1   :  { %v8_v0 = vld [vmem:[%s72_s0] sm:$0xff] }
   0x2   :  { %v14_v1 = vand.u32 2147483647, %v8_v0  ;;  %v38_v6 = vmul.f32 1.442695, %v8_v0  ;;  %v10_v11 = vand.u32 127, %v9_v8  ;;  %v11_v14 = vmax.f32 %v8_v0, 0.0 }
   0x3   :  { %vm12_vm5 = vcmp.ne.f32.partialorder %v8_v0, %v8_v0  ;;  %v33_v18 = vmul.f32 %v8_v0, %v8_v0 }
   0x4   :  { %v15_v2 = vsub.f32 0.0, %v14_v1  ;;  %vm29_vm1 = vcmp.ge.s32.totalorder %v10_v11, 1  ;;  %vm30_vm2 = vcmp.lt.s32.totalorder %v10_v11, 2  ;;  %vm34_vm3 = vcmp.ge.s32.totalorder %v10_v11, 2 }
   0x5   :  { %vm35_vm4 = vcmp.lt.s32.totalorder %v10_v11, 3  ;;  %vm40_vm6 = vcmp.ge.s32.totalorder %v10_v11, 3  ;;  %vm41_vm7 = vcmp.lt.s32.totalorder %v10_v11, 4  ;;  %vm31_vm8 = vmand %vm29_vm1, %vm30_vm2 }
   0x6   :  { %v16_v3 = vmul.f32 1.442695, %v15_v2  ;;  %vm36_vm9 = vmand %vm34_vm3, %vm35_vm4 }
   0x7   :  { %vm42_vm10 = vmand %vm40_vm6, %vm41_vm7 }
   0x8   :  { %50 = vpow2.f32 %v16_v3 }
  0x15   :  { %v51_v4 = vpop.eup %50 }
  0x16   :  { %v18_v5 = vadd.f32 1.0, %v51_v4  ;;  %v21_v7 = vmul.f32 -0.5, %v51_v4  ;;  %v24_v10 = vand.u32 2147483647, %v51_v4 }
  0x18   :  { %52 = vlog2.f32 %v18_v5  ;;  %v22_v9 = vadd.f32 1.0, %v21_v7  ;;  %vm25_vm0 = vcmp.lt.f32.partialorder %v24_v10, 0.0004427343 }
  0x19   :  { %54 = vpow2.f32 %v38_v6 }
  0x1a   :  { %v23_v12 = vmul.f32 %v51_v4, %v22_v9 }
  0x25   :  { %v53_v13 = vpop.eup %52 }
  0x26   :  { %v20_v15 = vmul.f32 0.6931472, %v53_v13  ;;  %v55_v19 = vpop.eup %54 }
  0x28   :  { %v26_v16 = vsel %vm25_vm0, %v23_v12, %v20_v15 }
  0x29   :  { %v27_v17 = vadd.f32 %v26_v16, %v11_v14 }
  0x2b   :  { %v28_v20 = vsel %vm12_vm5, %v8_v0, %v27_v17 }
  0x2c   :  { %v32_v21 = vsel %vm31_vm8, %v28_v20, %v8_v0 }
  0x2d   :  { %v37_v22 = vsel %vm36_vm9, %v33_v18, %v32_v21 }
  0x2e   :  { %v43_v23 = vsel %vm42_vm10, %v55_v19, %v37_v22 }
  0x2f   :  { %45 = vst.msk [vmem:[%s73_s1] sm:$0xff] %vm44_vm11, %v43_v23 }

</bundles_post_ra>
